<compile_context>
chip_gen: v5e
topology: v5e:2x2
jax: 0.10.0
libtpu: 0.0.40
codegen_flags: <defaults>
</compile_context>

<pallas_src>
import jax
import jax.numpy as jnp
from jax.experimental import pallas as pl
from jax.experimental.pallas import tpu as pltpu


def pen_mean_kernel(x_ref, gw_ref, gb_ref, lw_ref, o_ref):
    # x_ref:  (Bt, N, D_in)   Bt batch elements per grid step
    # gw_ref: (D_in, D_out)   Gamma weight (transposed vs torch)
    # gb_ref: (1, D_out)      Gamma bias
    # lw_ref: (D_in, D_out)   Lambda weight (transposed vs torch, no bias)
    # o_ref:  (Bt, N, D_out)
    x = x_ref[...]
    bt, n, d_in = x.shape
    d_out = o_ref.shape[-1]

    # Gamma(x): one big MXU matmul over all Bt*N rows.
    x2 = x.reshape(bt * n, d_in)
    g = jnp.dot(x2, gw_ref[...], preferred_element_type=jnp.float32)   # (Bt*N, D_out)
    g = g.reshape(bt, n, d_out)

    # Mean over the set axis, accumulated in f32 (robust for bf16 inputs).
    xm = jnp.sum(x.astype(jnp.float32), axis=1) * (1.0 / n)            # (Bt, D_in)

    # Lambda(xm): small (Bt, D_in) @ (D_in, D_out) matmul.
    lam = jnp.dot(xm.astype(lw_ref.dtype), lw_ref[...],
                  preferred_element_type=jnp.float32)                  # (Bt, D_out)

    # Fold bias and lambda correction into a single broadcast add.
    corr = gb_ref[...] - lam                                           # (Bt, D_out)
    o_ref[...] = (g + corr[:, None, :]).astype(o_ref.dtype)


def pen_mean(x, gamma_w, gamma_b, lambda_w, *, block_b=None):
    """x: (B, N, D_in); gamma_w/lambda_w: (D_in, D_out); gamma_b: (D_out,)."""
    B, N, D_in = x.shape
    D_out = gamma_w.shape[1]
    gb2 = gamma_b.reshape(1, D_out)

    if block_b is None:
        # Target a few MiB of x+out tile per step, but keep >=2 grid steps
        # (when B allows) so the batch axis can shard across v7x's 2 TCs.
        bytes_per_b = N * (D_in + D_out) * jnp.dtype(x.dtype).itemsize
        target = max(1, (4 * 1024 * 1024) // max(bytes_per_b, 1))
        if B >= 2:
            target = min(target, B // 2)
        block_b = max(d for d in range(1, B + 1) if B % d == 0 and d <= target)
    grid_b = B // block_b

    # TODO(synk): for very large D_in/D_out (v7x 64 MiB VMEM), add a second
    # grid axis tiling D_out columns of gamma_w/lambda_w.
    return pl.pallas_call(
        pen_mean_kernel,
        out_shape=jax.ShapeDtypeStruct((B, N, D_out), x.dtype),
        grid_spec=pltpu.PrefetchScalarGridSpec(
            num_scalar_prefetch=0,
            grid=(grid_b,),
            in_specs=[
                pl.BlockSpec((block_b, N, D_in), lambda b: (b, 0, 0)),
                pl.BlockSpec((D_in, D_out), lambda b: (0, 0)),
                pl.BlockSpec((1, D_out), lambda b: (0, 0)),
                pl.BlockSpec((D_in, D_out), lambda b: (0, 0)),
            ],
            out_specs=pl.BlockSpec((block_b, N, D_out), lambda b: (b, 0, 0)),
        ),
        compiler_params=pltpu.CompilerParams(
            dimension_semantics=("parallel",)),
    )(x, gamma_w, gb2, lambda_w)


def pen_mean_ref(x, gamma_w, gamma_b, lambda_w):
    xm = jnp.mean(x, axis=1, keepdims=True)
    return (x @ gamma_w + gamma_b) - (xm @ lambda_w)


if __name__ == "__main__":
    key = jax.random.PRNGKey(0)
    B, N, D_in, D_out = 8, 16, 32, 128

    k1, k2, k3, k4 = jax.random.split(key, 4)
    x = jax.random.normal(k1, (B, N, D_in), dtype=jnp.float32)

    # Deterministic parameter init (uniform, like nn.Linear default scale).
    bound_g = 1.0 / (D_in ** 0.5)
    gamma_w = jax.random.uniform(k2, (D_in, D_out), jnp.float32,
                                 minval=-bound_g, maxval=bound_g)
    gamma_b = jax.random.uniform(k3, (D_out,), jnp.float32,
                                 minval=-bound_g, maxval=bound_g)
    lambda_w = jax.random.uniform(k4, (D_in, D_out), jnp.float32,
                                  minval=-bound_g, maxval=bound_g)

    out = pen_mean(x, gamma_w, gamma_b, lambda_w)
    out = jax.block_until_ready(out)

    ref = pen_mean_ref(x, gamma_w, gamma_b, lambda_w)
    assert out.shape == (B, N, D_out)
    assert jnp.allclose(out, ref, atol=1e-4, rtol=1e-4), "mismatch vs reference"

    print("KERNEL_OK")
</pallas_src>

<mosaic_0001>
module attributes {stable_mosaic.version = 11 : i64} {
  func.func @pen_mean_kernel(%arg0: i32, %arg1: memref<4x16x32xf32, #tpu.memory_space<vmem>>, %arg2: memref<32x128xf32, #tpu.memory_space<vmem>>, %arg3: memref<1x128xf32, #tpu.memory_space<vmem>>, %arg4: memref<32x128xf32, #tpu.memory_space<vmem>>, %arg5: memref<4x16x128xf32, #tpu.memory_space<vmem>>) attributes {dimension_semantics = [#tpu.dimension_semantics<parallel>], iteration_bounds = array<i64: 2>, scalar_prefetch = 0 : i64, scratch_operands = 0 : i64, tpu.core_type = #tpu.core_type<tc>, window_params = [{transform_indices = @transform_0, window_bounds = array<i64: 4, 16, 32>}, {pipeline_mode = #tpu.pipeline_mode<synchronous>, transform_indices = @transform_1, window_bounds = array<i64: 32, 128>}, {pipeline_mode = #tpu.pipeline_mode<synchronous>, transform_indices = @transform_2, window_bounds = array<i64: 1, 128>}, {pipeline_mode = #tpu.pipeline_mode<synchronous>, transform_indices = @transform_3, window_bounds = array<i64: 32, 128>}, {transform_indices = @transform_4, window_bounds = array<i64: 4, 16, 128>}]} {
    %c0 = arith.constant 0 : index
    %c0_0 = arith.constant 0 : index
    %c0_1 = arith.constant 0 : index
    %0 = vector.load %arg1[%c0, %c0_0, %c0_1] : memref<4x16x32xf32, #tpu.memory_space<vmem>>, vector<4x16x32xf32>
    %1 = vector.shape_cast %0 : vector<4x16x32xf32> to vector<64x32xf32>
    %c0_2 = arith.constant 0 : index
    %c0_3 = arith.constant 0 : index
    %2 = vector.load %arg2[%c0_2, %c0_3] : memref<32x128xf32, #tpu.memory_space<vmem>>, vector<32x128xf32>
    %cst = arith.constant dense<0.000000e+00> : vector<64x128xf32>
    %3 = tpu.matmul %1, %2, %cst {dimension_numbers = #tpu.dot_dimension_numbers<[1], [0], [0], [1], [0, 0, 1, 1], [], []>} : vector<64x32xf32>, vector<32x128xf32>, vector<64x128xf32> -> vector<64x128xf32>
    %4 = vector.shape_cast %3 : vector<64x128xf32> to vector<4x16x128xf32>
    %cst_4 = arith.constant dense<0.000000e+00> : vector<4x32xf32>
    %5 = vector.multi_reduction <add>, %0, %cst_4 [1] : vector<4x16x32xf32> to vector<4x32xf32>
    %cst_5 = arith.constant 6.250000e-02 : f32
    %6 = vector.broadcast %cst_5 : f32 to vector<4x32xf32>
    %7 = arith.mulf %5, %6 : vector<4x32xf32>
    %c0_6 = arith.constant 0 : index
    %c0_7 = arith.constant 0 : index
    %8 = vector.load %arg4[%c0_6, %c0_7] : memref<32x128xf32, #tpu.memory_space<vmem>>, vector<32x128xf32>
    %cst_8 = arith.constant dense<0.000000e+00> : vector<4x128xf32>
    %9 = tpu.matmul %7, %8, %cst_8 {dimension_numbers = #tpu.dot_dimension_numbers<[1], [0], [0], [1], [0, 0, 1, 1], [], []>} : vector<4x32xf32>, vector<32x128xf32>, vector<4x128xf32> -> vector<4x128xf32>
    %c0_9 = arith.constant 0 : index
    %c0_10 = arith.constant 0 : index
    %10 = vector.load %arg3[%c0_9, %c0_10] : memref<1x128xf32, #tpu.memory_space<vmem>>, vector<1x128xf32>
    %11 = vector.broadcast %10 : vector<1x128xf32> to vector<4x128xf32>
    %12 = arith.subf %11, %9 : vector<4x128xf32>
    %13 = vector.shape_cast %12 : vector<4x128xf32> to vector<4x1x128xf32>
    %14 = vector.broadcast %13 : vector<4x1x128xf32> to vector<4x16x128xf32>
    %15 = arith.addf %4, %14 : vector<4x16x128xf32>
    %c0_11 = arith.constant 0 : index
    %c0_12 = arith.constant 0 : index
    %c0_13 = arith.constant 0 : index
    %16 = vector.load %arg5[%c0_11, %c0_12, %c0_13] : memref<4x16x128xf32, #tpu.memory_space<vmem>>, vector<4x16x128xf32>
    tpu.vector_store %arg5[%c0_11, %c0_12, %c0_13], %15 {strides = array<i32>} : memref<4x16x128xf32, #tpu.memory_space<vmem>>, vector<4x16x128xf32>,
    return
  }
  func.func @transform_0(%arg0: i32) -> (i32, i32, i32) {
    %c0_i32 = arith.constant 0 : i32
    %c0_i32_0 = arith.constant 0 : i32
    %c0_i32_1 = arith.constant 0 : i32
    return %arg0, %c0_i32, %c0_i32_0 : i32, i32, i32
  }
  func.func @transform_1(%arg0: i32) -> (i32, i32) {
    %c0_i32 = arith.constant 0 : i32
    %c0_i32_0 = arith.constant 0 : i32
    %c0_i32_1 = arith.constant 0 : i32
    return %c0_i32, %c0_i32_0 : i32, i32
  }
  func.func @transform_2(%arg0: i32) -> (i32, i32) {
    %c0_i32 = arith.constant 0 : i32
    %c0_i32_0 = arith.constant 0 : i32
    %c0_i32_1 = arith.constant 0 : i32
    return %c0_i32, %c0_i32_0 : i32, i32
  }
  func.func @transform_3(%arg0: i32) -> (i32, i32) {
    %c0_i32 = arith.constant 0 : i32
    %c0_i32_0 = arith.constant 0 : i32
    %c0_i32_1 = arith.constant 0 : i32
    return %c0_i32, %c0_i32_0 : i32, i32
  }
  func.func @transform_4(%arg0: i32) -> (i32, i32, i32) {
    %c0_i32 = arith.constant 0 : i32
    %c0_i32_0 = arith.constant 0 : i32
    %c0_i32_1 = arith.constant 0 : i32
    return %arg0, %c0_i32, %c0_i32_0 : i32, i32, i32
  }
}

</mosaic_0001>

<bundles_post_ra>
// kernel: tpu_custom_call.1
= control target key start
LH: loop header
LB: loop body
LE: loop exit
PB: predicated region body
PF: predicated region fallthrough
CT: control target
= control target key end

     0   :  { %9 = vsyncpa [#allocation3], 0  ;;  %s1048_s0 = inlined_call_operand.hbm [shape: f32[8,16,32], index: 0, kind: input, shape index: {}]   ;;  %s1049_s1 = inlined_call_operand.hbm [shape: f32[32,128], index: 1, kind: input, shape index: {}]   ;;  %s1050_s2 = inlined_call_operand.vmem [shape: f32[1,128], index: 2, kind: input, shape index: {}]   ;;  %s1051_s3 = inlined_call_operand.hbm [shape: f32[32,128], index: 3, kind: input, shape index: {}]   ;;  %s1052_s4 = inlined_call_operand.hbm [shape: f32[8,16,128], index: 4, kind: output, shape index: {}]  }
   0x1   :  { %11 = vsyncpa [#allocation3 + $0x1], 0 }
   0x2   :  { %12 = vsyncpa [#allocation6], 0 }
   0x3   :  { %13 = vsyncpa [#allocation4], 0 }
   0x4   :  { %15 = vsyncpa [#allocation4 + $0x1], 0  ;;  %s856_s15 = smov 0   ;;  %s858_s16 = smov 0  }
   0x5   :  { %s860_s17 = smov 0   ;;  %s862_s18 = smov 0  }
   0x6 LB: > { %s877_s19 = sadd.s32 4294967295, %s823_s18   ;;  %s550_s20 = sadd.s32 4294967294, %s823_s18   ;;  %s823_s18 = sphi %s862_s18, %s1062_s18   ;;  %s819_s17 = sphi %s860_s17, %s1061_s17   ;;  %s815_s16 = sphi %s858_s16, %s1060_s16   ;;  %s811_s15 = sphi %s856_s15, %s1059_s15  }
   0x7   : > { %p41_p0 = scmp.ne.s32.totalorder %s815_s16, %s811_s15  ;;  %p42_p1 = scmp.eq.s32.totalorder %s877_s19, 0 }
   0x8   : > { %p128_p2 = scmp.eq.s32.totalorder %s877_s19, 1  ;;  %p134_p3 = scmp.eq.s32.totalorder %s550_s20, 1 }
   0x9   : > { %p886_p4 = por %p42_p1, %p41_p0  ;;  %p551_p5 = scmp.ge.s32.totalorder %s823_s18, 1 }
   0xa   : > { %p891_p6 = por %p134_p3, %p41_p0  ;;  %p141_p7 = scmp.lt.s32.totalorder %s823_s18, 3 }
   0xb   : > { %s152_s25 = sshll.u32 %s1049_s1, 4  ;;  %s825_s27 = smov [#allocation5]   ;;  %s153_s25 = int_to_ptr.hbm [resolvable:$true] %s152_s25 }
   0xc   : > { %p899_p8 = pnand %p551_p5, %p141_p7  ;;  %s154_s28 = sshll.u32 %s825_s27, 4  ;;  %s155_s28 = int_to_ptr.vmem [resolvable:$true] %s154_s28 }
   0xd   : > { %s169_s5 = sshll.u32 %s1051_s3, 4  ;;  %s826_s6 = smov 128   ;;  %s170_s5 = int_to_ptr.hbm [resolvable:$true] %s169_s5 }
   0xe   : > { %p603_p9 = pneg %p899_p8  ;;  %s827_s7 = smov 8  }
   0xf   : > { %s828_s8 = smov [#allocation7]   ;;  %s918_s10 = sadd.s32 1, %s823_s18  }
  0x10   : > { %p604_p10 = pnand %p603_p9, %p42_p1  ;;  %s171_s9 = sshll.u32 %s828_s8, 4  ;;  %s172_s9 = int_to_ptr.vmem [resolvable:$true] %s171_s9 }
  0x11   : > { %s28_s11 = sadd.s32 1, %s819_s17  ;;  %s25_s12 = ssub.s32 %s823_s18, %s918_s10 }
  0x12   : > { %606 = dma.hbm_to_vmem [thread:$0]  (!%p604_p10), %s153_s25, 512, %s155_s28, [#allocation6], %s826_s6, %s826_s6, %s827_s7  }
  0x13   : > { %609 = dma.hbm_to_vmem [thread:$0]  (!%p604_p10), %s170_s5, 512, %s172_s9, [#allocation6], %s826_s6, %s826_s6, %s827_s7  }
  0x14   : > { %p35_p12 = scmp.ne.s32.totalorder %s819_s17, %s815_s16  ;;  %p26_p13 = scmp.eq.s32.totalorder %s25_s12, 0 }
  0x15   : > { %p36_p0 = scmp.eq.s32.totalorder %s823_s18, 0  ;;  %p620_p5 = scmp.lt.s32.totalorder %s823_s18, 2 }
  0x16   : > { %p928_p3 = por %p128_p2, %p35_p12  ;;  %s185_s20 = sand.u32 1, %s819_s17  }
  0x17   : > { %s934_s14 = scalar_select %p26_p13, %s819_s17, %s28_s11  }
  0x18   : > { %p37_p7 = por %p36_p0, %p35_p12  ;;  %s555_s23 = sshll.u32 %s185_s20, 6 }
  0x19   : > { %s580_s24 = sshll.u32 %s823_s18, 6  ;;  %s189_s29 = scalar_lea.vmem [#allocation2], %s555_s23 }
  0x1a   : > { %s195_s28 = scalar_lea.hbm %s1048_s0, %s580_s24  ;;  %s198_s30 = sshll.u32 %s189_s29, 4  ;;  %s199_s30 = int_to_ptr.vmem [resolvable:$true] %s198_s30 }
  0x1b   : > { %s196_s5 = sshll.u32 %s195_s28, 4  ;;  %p941_p2 = pnand %p620_p5, %p37_p7  ;;  %s197_s5 = int_to_ptr.hbm [resolvable:$true] %s196_s5 }
  0x1c   : > { %s186_s9 = scalar_lea.sflag [#allocation3], %s185_s20  ;;  %s723_s11 = sshra.s32 %s197_s5, 4  ;;  %s724_s11 = int_to_ptr.hbm [resolvable:$true] %s723_s11 }
  0x1d   : > { %s725_s12 = scalar_lea.hbm %s724_s11, 64  ;;  %p727_p10 = pneg %p941_p2 }
  0x1e   : > { %p726_p9 = scmp.ne.s32.totalorder %s724_s11, %s725_s12  ;;  %s730_s25 = scalar_lea.hbm %s1048_s0, 128 }
  0x1f   : > { %p731_p0 = scmp.lt.s32.totalorder %s724_s11, %s1048_s0  ;;  %p732_p5 = scmp.lt.s32.totalorder %s730_s25, %s725_s12 }
  0x20   : > { %p728_p12 = pnand %p727_p10, %p726_p9 }
  0x21   : > { %p733_p7 = por %p732_p5, %p731_p0 }
  0x22   : > { %p729_p13 = pneg %p728_p12 }
  0x24   : > { %p734_p11 = pnand %p733_p7, %p729_p13 }
  0x26   : > { %737 = shalt.err (!%p734_p11)
}
  0x27   : > { %613 = dma.hbm_to_vmem [thread:$0]  (!%p941_p2), %s197_s5, 1024, %s199_s30, %s186_s9, %s826_s6, %s826_s6, %s827_s7  }
  0x28   : > { %210 = sbr.rel (%p899_p8) target bundleno = 216 (0xd8), region = 36  ;;  %s961_s20 = sand.u32 (!%p899_p8), 1, %s815_s16  }
  0x29   : > { %s560_s29 = sshll.u32 (!%p899_p8), %s961_s20, 6  ;;  %s213_s11 = scalar_lea.sflag (!%p899_p8), [#allocation3], %s961_s20 }
  0x2a   : > { %s967_s12 = scalar_lea.vmem (!%p899_p8), [#allocation2], %s560_s29 }
  0x2d   : > { %798 = dma.done.wait (%p886_p4), %s213_s11, 1024  }
  0x2e   : > { %800 = vsyncadd (%p886_p4), %s213_s11, 4294966272 }
  0x2f   : > { %802 = dma.done.wait (%p42_p1), [#allocation6], 1024  }
  0x30   : > { %804 = vsyncadd (%p42_p1), [#allocation6], 4294966272  ;;  %vm266_vm0 = vcmask 261120   ;;  %v265_v0 = vld [vmem:[#allocation5 + $0x18] sm:$0xff]  ;;  %v264_v1 = vld [vmem:[#allocation5 + $0x10] sm:$0xff]  ;;  %vm380_vm1 = vcmask 1041409  }
  0x31   : > { %583 = vmatpush.msra.mxu2 %v265_v0  ;;  %584 = vmatpush.msra.mxu3 %v265_v0  ;;  %v263_v2 = vld [vmem:[#allocation5 + $0x8] sm:$0xff]  ;;  %v256_v3 = vld [vmem:[%s967_s12 + $0x10] sm:$0xff]  ;;  %v979_v4 = vld [vmem:[%s967_s12 + $0x20] sm:$0xff]  ;;  %vm382_vm2 = vcmask 1042434   ;;  %vm384_vm3 = vcmask 1043459   ;;  %s582_s6 = sshll.u32 %s877_s19, 6 }
  0x32   : > { %v341_v5 = vsel %vm266_vm0, %v256_v3, 0.0  ;;  %v259_v6 = vld [vmem:[%s967_s12 + $0x28] sm:$0xff]  ;;  %v350_v7 = vsel %vm266_vm0, %v979_v4, 0.0  ;;  %303 = vmatpush.msra.mxu0 %v265_v0  ;;  %v375_v8 = vld [vmem:[#allocation7 + $0x18] sm:$0xff]  ;;  %v260_v12 = vld [vmem:[%s967_s12 + $0x30] sm:$0xff]  ;;  %s454_s5 = scalar_lea.hbm %s1052_s4, %s582_s6  ;;  %s251_s8 = scalar_lea.vmem [#allocation8], %s560_s29 }
  0x33   : > { %v257_v9 = vld [vmem:[%s967_s12 + $0x18] sm:$0xff]  ;;  %585 = vmatpush.msra.mxu2 %v264_v1  ;;  %586 = vmatpush.msra.mxu3 %v264_v1  ;;  %v351_v10 = vsel %vm266_vm0, %v259_v6, 0.0  ;;  %v374_v14 = vld [vmem:[#allocation7 + $0x10] sm:$0xff]  ;;  %v262_v15 = vld [vmem:[#allocation5] sm:$0xff]  ;;  %v359_v18 = vsel %vm266_vm0, %v260_v12, 0.0  ;;  %s455_s9 = sshll.u32 %s251_s8, 4  ;;  %s456_s9 = int_to_ptr.vmem [resolvable:$true] %s455_s9 }
  0x34   : > { %v342_v11 = vsel %vm266_vm0, %v257_v9, 0.0  ;;  %v990_v13 = vld [vmem:[%s967_s12 + $0x38] sm:$0xff]  ;;  %v352_v16 = vadd.f32 %v351_v10, %v350_v7  ;;  %400 = vmatpush.msra.mxu1 %v375_v8  ;;  %304 = vmatpush.msra.mxu0 %v264_v1  ;;  %v254_v20 = vld [vmem:[%s967_s12] sm:$0xff]  ;;  %v255_v21 = vld [vmem:[%s967_s12 + $0x8] sm:$0xff]  ;;  %s457_s19 = sshll.u32 %s454_s5, 4  ;;  %s442_s24 = scalar_lea.sflag [#allocation4], %s961_s20  ;;  %s458_s19 = int_to_ptr.hbm [resolvable:$true] %s457_s19 }
  0x35   : > { %v343_v17 = vadd.f32 %v342_v11, %v341_v5  ;;  %v360_v19 = vsel %vm266_vm0, %v990_v13, 0.0  ;;  %587 = vmatpush.msra.mxu2 %v263_v2  ;;  %588 = vmatpush.msra.mxu3 %v263_v2  ;;  %v332_v23 = vsel %vm266_vm0, %v254_v20, 0.0  ;;  %v333_v24 = vsel %vm266_vm0, %v255_v21, 0.0  ;;  %v373_v27 = vld [vmem:[#allocation7 + $0x8] sm:$0xff]  ;;  %v372_v33 = vld [vmem:[#allocation7] sm:$0xff]  ;;  %s767_s23 = sshra.s32 %s458_s19, 4  ;;  %s768_s23 = int_to_ptr.hbm [resolvable:$true] %s767_s23 }
  0x36   : > { %v361_v22 = vadd.f32 %v360_v19, %v359_v18  ;;  %v353_v25 = vrot.slane %v352_v16, 4  ;;  %401 = vmatpush.msra.mxu1 %v374_v14  ;;  %305 = vmatpush.msra.mxu0 %v263_v2  ;;  %v334_v28 = vadd.f32 %v333_v24, %v332_v23  ;;  %v662_v62 = vld [vmem:[%s1050_s2] ss:$0 sm:$0xff]  ;;  %s769_s25 = scalar_lea.hbm %s768_s23, 64  ;;  %s773_s29 = scalar_lea.hbm %s1052_s4, 128 }
  0x37   : > { %v344_v26 = vrot.slane %v343_v17, 4  ;;  %589 = vmatpush.msra.mxu2 %v262_v15  ;;  %590 = vmatpush.msra.mxu3 %v262_v15  ;;  %p770_p1 = scmp.ne.s32.totalorder %s768_s23, %s769_s25  ;;  %p774_p11 = scmp.lt.s32.totalorder %s768_s23, %s1052_s4 }
  0x38   : > { %v362_v29 = vrot.slane %v361_v22, 4  ;;  %566 = vmatmul.msk.f32.vlgmr.msra.gmra.mxu2 %vm266_vm0, %v256_v3  ;;  %569 = vmatmul.msk.f32.vlgmr.msra.gmra.mxu3 %vm266_vm0, %v259_v6  ;;  %v354_v30 = vadd.f32 %v353_v25, %v352_v16  ;;  %v335_v32 = vrot.slane %v334_v28, 4  ;;  %p775_p2 = scmp.lt.s32.totalorder %s773_s29, %s769_s25 }
  0x39   : > { %v345_v31 = vadd.f32 %v344_v26, %v343_v17  ;;  %402 = vmatpush.msra.mxu1 %v373_v27  ;;  %306 = vmatpush.msra.mxu0 %v262_v15  ;;  %p771_p4 = pnand %p770_p1, %p928_p3 }
  0x3a   : > { %v363_v34 = vadd.f32 %v362_v29, %v361_v22  ;;  %v355_v35 = vrot.slane %v354_v30, 2  ;;  %564 = vmatmul.msk.f32.vlgmr.msra.gmra.mxu0 %vm266_vm0, %v254_v20  ;;  %v336_v37 = vadd.f32 %v335_v32, %v334_v28  ;;  %p776_p9 = por %p775_p2, %p774_p11 }
  0x3b   : > { %v346_v36 = vrot.slane %v345_v31, 2  ;;  %403 = vmatpush.msra.mxu1 %v372_v33  ;;  %p772_p8 = pneg %p771_p4 }
  0x3c   : > { %v364_v38 = vrot.slane %v363_v34, 2  ;;  %v356_v39 = vadd.f32 %v355_v35, %v354_v30  ;;  %v337_v41 = vrot.slane %v336_v37, 2 }
  0x3d   : > { %v347_v40 = vadd.f32 %v346_v36, %v345_v31  ;;  %p777_p10 = pnand %p776_p9, %p772_p8 }
  0x3e   : > { %v365_v42 = vadd.f32 %v364_v38, %v363_v34  ;;  %v357_v43 = vrot.slane %v356_v39, 1  ;;  %v338_v45 = vadd.f32 %v337_v41, %v336_v37 }
  0x3f   : > { %v348_v44 = vrot.slane %v347_v40, 1 }
  0x40   : > { %v366_v46 = vrot.slane %v365_v42, 1  ;;  %567 = vmatmul.msk.f32.gmra.mxu2 %vm266_vm0, %v257_v9  ;;  %570 = vmatmul.msk.f32.gmra.mxu3 %vm266_vm0, %v260_v12  ;;  %v339_v48 = vrot.slane %v338_v45, 1  ;;  %v358_v49 = vadd.f32 %v357_v43, %v356_v39 }
  0x41   : > { %v349_v47 = vadd.f32 %v348_v44, %v347_v40 }
  0x42   : > { %v367_v50 = vadd.f32 %v366_v46, %v365_v42  ;;  %v340_v52 = vadd.f32 %v339_v48, %v338_v45  ;;  %565 = vmatmul.msk.f32.gmra.mxu0 %vm266_vm0, %v255_v21  ;;  %v370_v53 = vmul.f32 0.0625, %v358_v49 }
  0x43   : > { %v369_v51 = vmul.f32 0.0625, %v349_v47 }
  0x44   : > { %v368_v54 = vmul.f32 0.0625, %v340_v52  ;;  %v371_v55 = vmul.f32 0.0625, %v367_v50 }
  0x46   : > { %v381_v56 = vsel %vm380_vm1, %v369_v51, %v368_v54 }
  0x47   : > { %v383_v57 = vsel %vm382_vm2, %v370_v53, %v381_v56 }
  0x48   : > { %v385_v58 = vsel %vm384_vm3, %v371_v55, %v383_v57  ;;  %568 = vmatmul.msk.f32.gmra.mxu2 %vm266_vm0, %v979_v4  ;;  %571 = vmatmul.msk.f32.gmra.mxu3 %vm266_vm0, %v990_v13 }
  0x49   : > { %572 = vmatmul.msk.f32.vlgmr.msra.gmra.mxu1 %vm266_vm0, %v385_v58 }
  0xb7   : > { %v308_v61 = vpop.f32.mrf.mxu0 }
  0xbb   : > { %v314_v59 = vpop.f32.mrf.mxu2  ;;  %v323_v60 = vpop.f32.mrf.mxu3 }
  0xbf   : > { %v311_v3 = vpop.f32.mrf.mxu0 }
  0xc3   : > { %v317_v63 = vpop.f32.mrf.mxu2  ;;  %v326_v0 = vpop.f32.mrf.mxu3 }
  0xc6   : > { %v405_v1 = vpop.f32.mrf.mxu1 }
  0xc7   : > { %v412_v2 = vsub.f32 %v662_v62, %v405_v1 }
  0xc9   : > { %v414_v4 = vrot.slane %v412_v2, 1  ;;  %v416_v5 = vrot.slane %v412_v2, 3  ;;  %v417_v6 = vperm.slane %v412_v2, 0  ;;  %v415_v7 = vrot.slane %v412_v2, 2 }
  0xcb   : > { %v418_v8 = vperm.slane %v414_v4, 0  ;;  %v420_v9 = vperm.slane %v416_v5, 0  ;;  %v425_v10 = vadd.f32 %v417_v6, %v308_v61  ;;  %v426_v11 = vadd.f32 %v417_v6, %v311_v3  ;;  %v320_v12 = vpop.f32.mrf.mxu2  ;;  %v329_v17 = vpop.f32.mrf.mxu3 }
  0xcc   : > { %v419_v13 = vperm.slane %v415_v7, 0 }
  0xcd   : > { %v427_v14 = vadd.f32 %v418_v8, %v314_v59  ;;  %v428_v15 = vadd.f32 %v418_v8, %v317_v63  ;;  %v431_v16 = vadd.f32 %v420_v9, %v326_v0  ;;  %433 = vst [vmem:[%s251_s8] sm:$0xff] %v425_v10  ;;  %v432_v20 = vadd.f32 %v420_v9, %v329_v17 }
  0xce   : > { %434 = vst [vmem:[%s251_s8 + $0x8] sm:$0xff] %v426_v11  ;;  %v429_v18 = vadd.f32 %v419_v13, %v320_v12  ;;  %v430_v19 = vadd.f32 %v419_v13, %v323_v60 }
  0xcf   : > { %435 = vst [vmem:[%s251_s8 + $0x10] sm:$0xff] %v427_v14 }
  0xd0   : > { %436 = vst [vmem:[%s251_s8 + $0x18] sm:$0xff] %v428_v15 }
  0xd1   : > { %439 = vst [vmem:[%s251_s8 + $0x30] sm:$0xff] %v431_v16 }
  0xd2   : > { %437 = vst [vmem:[%s251_s8 + $0x20] sm:$0xff] %v429_v18 }
  0xd3   : > { %438 = vst [vmem:[%s251_s8 + $0x28] sm:$0xff] %v430_v19 }
  0xd4   : > { %440 = vst [vmem:[%s251_s8 + $0x38] sm:$0xff] %v432_v20 }
  0xd5   : > { %780 = shalt.err (!%p777_p10)
}
  0xd6   : > { %s829_s20 = smov 128   ;;  %s830_s21 = smov 8  }
  0xd7   : > { %601 = dma.vmem_to_hbm [thread:$0]  (%p928_p3), %s456_s9, 1024, %s458_s19, %s442_s24, %s829_s20, %s829_s20, %s830_s21  }
  0xd8 PF: > { %s472_s26 = sand.u32 1, %s811_s15   ;;  %p1058_p12 = scmp.ge.s32.totalorder %s823_s18, 2 }
  0xd9   : > { %s473_s6 = scalar_lea.sflag [#allocation4], %s472_s26 }
  0xda   : > { %p615_p13 = pnand %p1058_p12, %p891_p6 }
  0xdc   : > { %p616_p0 = pneg %p615_p13 }
  0xde   : > { %806 = dma.done.wait (%p616_p0), %s473_s6, 1024  }
  0xdf   : > { %808 = vsyncadd (%p616_p0), %s473_s6, 4294966272  ;;  %p18_p5 = scmp.ge.s32.totalorder %s918_s10, 4   ;;  %s1059_s15 = smov %s815_s16 }
  0xe0   : > { %s1060_s16 = smov %s819_s17  ;;  %s1061_s17 = smov %s934_s14 }
  0xe1   : > { %s1062_s18 = smov %s918_s10  ;;  %20 = sbr.rel (!%p18_p5) target bundleno = 6 (0x6), region = 89 }
  0xe6   :  { %479 = vsyncpa [#allocation3], 1 }
  0xe7   :  { %481 = vsyncpa [#allocation3 + $0x1], 1 }
  0xe8   :  { %482 = vsyncpa [#allocation6], 1 }
  0xe9   :  { %483 = vsyncpa [#allocation4], 1 }
  0xea   :  { %485 = vsyncpa [#allocation4 + $0x1], 1 }

</bundles_post_ra>
